<compile_context>
chip_gen: v6e
topology: v6e:2x2x1
jax: 0.10.0
libtpu: 0.0.40
codegen_flags: <defaults>
</compile_context>

<pallas_src>
import jax
import jax.numpy as jnp
from jax.experimental import pallas as pl
from jax.experimental.pallas import tpu as pltpu


_EPS = 1e-10
_LANE = 128
_SMALL_BLOCK_BYTES = 512 << 10  # below this per input, grid-step overhead dominates DMA


def _sublane(itemsize):
    # Minimal second-to-last block dim: 8 for f32, 16 for bf16, 32 for 8-bit.
    return max(8, 32 // itemsize)


def _pad_up(x, m):
    return -(-x // m) * m


def _vmem_capacity_bytes():
    try:
        info = pltpu.get_tpu_info()
        cap = int(getattr(info, "vmem_capacity_bytes", 0))
        if cap > 0:
            return cap
    except Exception:
        pass
    return 64 << 20  # conservative fallback (v7x per-TensorCore VMEM)


# ----------------------------- kernels --------------------------------------


def _js_rowsum_kernel(p_ref, q_ref, o_ref):
    """General path. Grid = (row blocks, col blocks); the output block index is
    constant along the col axis, so o_ref stays resident in VMEM and is used as
    the accumulator (init on the first col step)."""

    @pl.when(pl.program_id(1) == 0)
    def _():
        o_ref[...] = jnp.zeros_like(o_ref)

    p = p_ref[...].astype(jnp.float32)
    q = q_ref[...].astype(jnp.float32)
    s = p + q
    eps = jnp.float32(_EPS)
    t = p * jnp.log(p + eps) + q * jnp.log(q + eps) - s * jnp.log(0.5 * s + eps)
    o_ref[...] += 0.5 * jnp.sum(t, axis=1, keepdims=True)


def _js_packed_kernel(p_ref, q_ref, seg_ref, o_ref):
    """Small-C path. Each lane-row carries G samples (G*C lanes). The per-sample
    segmented sum is a matmul with a constant block-diagonal matrix (0.5 factor
    folded in) on the otherwise idle MXU."""
    p = p_ref[...].astype(jnp.float32)
    q = q_ref[...].astype(jnp.float32)
    s = p + q
    eps = jnp.float32(_EPS)
    t = p * jnp.log(p + eps) + q * jnp.log(q + eps) - s * jnp.log(0.5 * s + eps)
    o_ref[...] = jnp.dot(t, seg_ref[...], preferred_element_type=jnp.float32)


# ----------------------------- planning -------------------------------------


def _pick_row_tile(n_rows, row_bytes, n_col_blocks, sublane, block_budget):
    """Row tile from the VMEM / pipelining budget (not from n_rows)."""
    total_bytes = n_rows * row_bytes * n_col_blocks
    # Tiny problem & single col block: one grid step (splitting only adds the
    # ~0.35us per-step overhead, no DMA-overlap / megacore benefit).
    if n_col_blocks == 1 and (total_bytes <= _SMALL_BLOCK_BYTES or n_rows <= sublane):
        return n_rows
    max_rows = max(sublane, block_budget // row_bytes)
    tile = sublane
    while tile * 2 <= max_rows and tile * 2 <= n_rows:
        tile *= 2
    # Prefer >= 4 row steps (double-buffer overlap, v7x megacore sharding) as
    # long as each step still moves >= ~512 KiB per input.
    while (tile > sublane and -(-n_rows // tile) < 4
           and (tile // 2) * row_bytes >= _SMALL_BLOCK_BYTES):
        tile //= 2
    return min(tile, n_rows)


def _compiler_params(semantics, in_block_bytes, out_block_bytes, extra_bytes,
                     buffer_count, cap):
    footprint = 2 * buffer_count * in_block_bytes + 2 * out_block_bytes + extra_bytes
    vmem_limit = int(min(cap - (8 << 20), max(footprint + (8 << 20), 32 << 20)))
    return pltpu.CompilerParams(
        dimension_semantics=semantics,
        vmem_limit_bytes=vmem_limit,
    )


# ----------------------------- wrapper ---------------------------------------


def jensen_shannon(p, q, *, row_tile=None, col_tile=None, buffer_count=None):
    """Pallas TPU Jensen-Shannon divergence. p, q: (N, C) -> (N,) float32."""
    assert p.shape == q.shape and p.ndim == 2, (p.shape, q.shape)
    N, C = p.shape
    itemsize = jnp.dtype(p.dtype).itemsize
    sublane = _sublane(itemsize)

    cap = _vmem_capacity_bytes()
    bc = buffer_count if buffer_count else 2
    # Keep the 2-inputs x buffer_count pipeline within half of physical VMEM,
    # capped at 32 MiB (safe on v7x's 64 MiB; generous on v5e/v6e's 128 MiB).
    pipeline_budget = min(cap // 2, 32 << 20)
    block_budget = max(1 << 20, pipeline_budget // (2 * bc))

    spec_kwargs = {}
    if buffer_count is not None and buffer_count != 2:
        spec_kwargs = dict(pipeline_mode=pl.Buffered(buffer_count))

    # ---------------- packed small-C path (C <= 64) ----------------
    if col_tile is None and C <= _LANE // 2:
        G = _LANE // C                      # samples per packed lane-row
        n_pad = _pad_up(N, G)
        if n_pad != N:
            # Zero-padded samples contribute exactly 0 and are sliced off below.
            p = jnp.pad(p, ((0, n_pad - N), (0, 0)))
            q = jnp.pad(q, ((0, n_pad - N), (0, 0)))
        rows = n_pad // G
        gc = G * C
        pp = p.reshape(rows, gc)
        qq = q.reshape(rows, gc)
        # Block-diagonal segment-sum matrix with the 0.5 JS factor folded in.
        seg = 0.5 * (jnp.arange(gc)[:, None] // C ==
                     jnp.arange(G)[None, :]).astype(jnp.float32)

        row_bytes = _pad_up(gc, _LANE) * itemsize
        rt = row_tile or _pick_row_tile(rows, row_bytes, 1, sublane, block_budget)
        rt = min(rt, rows)
        if rt < rows:
            assert rt % sublane == 0, (rt, sublane)
        grid = (-(-rows // rt),)            # cdiv: tail row block is masked

        in_spec = pl.BlockSpec((rt, gc), lambda i: (i, 0), **spec_kwargs)
        seg_spec = pl.BlockSpec((gc, G), lambda i: (0, 0))
        out_spec = pl.BlockSpec((rt, G), lambda i: (i, 0))

        out = pl.pallas_call(
            _js_packed_kernel,
            out_shape=jax.ShapeDtypeStruct((rows, G), jnp.float32),
            grid_spec=pltpu.PrefetchScalarGridSpec(
                num_scalar_prefetch=0,
                grid=grid,
                in_specs=[in_spec, in_spec, seg_spec],
                out_specs=out_spec,
            ),
            compiler_params=_compiler_params(
                ("parallel",),
                in_block_bytes=rt * row_bytes,
                out_block_bytes=rt * _LANE * 4,
                extra_bytes=_pad_up(gc, 8) * _LANE * 4,
                buffer_count=bc,
                cap=cap,
            ),
        )(pp, qq, seg)
        return out.reshape(n_pad)[:N]

    # ---------------- general path (optionally column-tiled) ----------------
    padded_c = _pad_up(C, _LANE)
    if col_tile is None:
        if sublane * padded_c * itemsize <= block_budget:
            col_tile = C                    # full class axis per block
        else:
            col_tile = max(_LANE,
                           (block_budget // (sublane * itemsize)) // _LANE * _LANE)

    if col_tile >= C:
        col_tile = C
        n_col_blocks = 1
    else:
        assert col_tile % _LANE == 0, "col_tile must be a multiple of 128 when < C"
        n_col_blocks = -(-C // col_tile)
        c_work = n_col_blocks * col_tile
        if c_work != C:
            # Zero-padded columns contribute exactly 0 to the row sums.
            p = jnp.pad(p, ((0, 0), (0, c_work - C)))
            q = jnp.pad(q, ((0, 0), (0, c_work - C)))

    row_bytes = _pad_up(col_tile, _LANE) * itemsize
    rt = row_tile or _pick_row_tile(N, row_bytes, n_col_blocks, sublane, block_budget)
    rt = min(rt, N)
    if rt < N:
        assert rt % sublane == 0, (rt, sublane)
    grid = (-(-N // rt), n_col_blocks)      # cdiv: tail row block is masked

    in_spec = pl.BlockSpec((rt, col_tile), lambda i, k: (i, k), **spec_kwargs)
    out_spec = pl.BlockSpec((rt, 1), lambda i, k: (i, 0))

    out = pl.pallas_call(
        _js_rowsum_kernel,
        out_shape=jax.ShapeDtypeStruct((N, 1), jnp.float32),
        grid_spec=pltpu.PrefetchScalarGridSpec(
            num_scalar_prefetch=0,
            grid=grid,
            in_specs=[in_spec, in_spec],
            out_specs=out_spec,
        ),
        compiler_params=_compiler_params(
            ("parallel", "arbitrary"),
            in_block_bytes=rt * row_bytes,
            out_block_bytes=rt * _LANE * 4,
            extra_bytes=0,
            buffer_count=bc,
            cap=cap,
        ),
    )(p, q)
    return out[:, 0]                        # (N,) to match PyTorch .sum(dim=1)


def jensen_shannon_ref(p, q):
    """Pure-JAX reference matching the PyTorch module exactly (f32 math)."""
    p = p.astype(jnp.float32)
    q = q.astype(jnp.float32)
    eps = 1e-10
    m = (p + q) / 2.0
    kl_pm = jnp.sum(p * jnp.log((p + eps) / (m + eps)), axis=1)
    kl_qm = jnp.sum(q * jnp.log((q + eps) / (m + eps)), axis=1)
    return 0.5 * kl_pm + 0.5 * kl_qm


if __name__ == "__main__":
    key = jax.random.PRNGKey(0)
    ks = jax.random.split(key, 8)

    def make_probs(k, shape, dtype=jnp.float32):
        return jax.nn.softmax(
            jax.random.normal(k, shape, dtype=jnp.float32), axis=1).astype(dtype)

    # 1) Clothing1M-style (N=64, C=14) f32 -> packed small-C path (G=9 samples/row).
    p1, q1 = make_probs(ks[0], (64, 14)), make_probs(ks[1], (64, 14))
    out1 = jax.block_until_ready(jensen_shannon(p1, q1))
    ref1 = jensen_shannon_ref(p1, q1)
    assert out1.shape == (64,)
    assert jnp.allclose(out1, ref1, atol=1e-5, rtol=1e-5), (out1, ref1)

    # 2) bf16 inputs on the packed path (math stays f32 in-kernel).
    p1b, q1b = p1.astype(jnp.bfloat16), q1.astype(jnp.bfloat16)
    out1b = jax.block_until_ready(jensen_shannon(p1b, q1b))
    ref1b = jensen_shannon_ref(p1b, q1b)
    assert jnp.allclose(out1b, ref1b, atol=1e-5, rtol=1e-5), (out1b, ref1b)

    # 3) General path: ragged N, single col block, single grid step (tiny problem).
    p2, q2 = make_probs(ks[2], (50, 200)), make_probs(ks[3], (50, 200))
    out2 = jax.block_until_ready(jensen_shannon(p2, q2))
    ref2 = jensen_shannon_ref(p2, q2)
    assert out2.shape == (50,)
    assert jnp.allclose(out2, ref2, atol=1e-5, rtol=1e-5), (out2, ref2)

    # 4) Column-split reduction path (forced col_tile) + ragged row tail + C padding.
    p3, q3 = make_probs(ks[4], (48, 300)), make_probs(ks[5], (48, 300))
    out3 = jax.block_until_ready(jensen_shannon(p3, q3, col_tile=128))
    ref3 = jensen_shannon_ref(p3, q3)
    assert out3.shape == (48,)
    assert jnp.allclose(out3, ref3, atol=1e-5, rtol=1e-5), (out3, ref3)

    # 5) Multi-step row grid on the general path (exercises double-buffering).
    p4, q4 = make_probs(ks[6], (1024, 256)), make_probs(ks[7], (1024, 256))
    out4 = jax.block_until_ready(jensen_shannon(p4, q4))
    ref4 = jensen_shannon_ref(p4, q4)
    assert out4.shape == (1024,)
    assert jnp.allclose(out4, ref4, atol=1e-5, rtol=1e-5), (out4, ref4)

    print("KERNEL_OK")
</pallas_src>

<mosaic_0001>
module attributes {stable_mosaic.version = 11 : i64} {
  func.func @_js_packed_kernel(%arg0: i32, %arg1: memref<8x126xf32, #tpu.memory_space<vmem>>, %arg2: memref<8x126xf32, #tpu.memory_space<vmem>>, %arg3: memref<126x9xf32, #tpu.memory_space<vmem>>, %arg4: memref<8x9xf32, #tpu.memory_space<vmem>>) attributes {dimension_semantics = [#tpu.dimension_semantics<parallel>], iteration_bounds = array<i64: 1>, scalar_prefetch = 0 : i64, scratch_operands = 0 : i64, tpu.core_type = #tpu.core_type<tc>, window_params = [{transform_indices = @transform_0, window_bounds = array<i64: 8, 126>}, {transform_indices = @transform_1, window_bounds = array<i64: 8, 126>}, {pipeline_mode = #tpu.pipeline_mode<synchronous>, transform_indices = @transform_2, window_bounds = array<i64: 126, 9>}, {transform_indices = @transform_3, window_bounds = array<i64: 8, 9>}]} {
    %c0 = arith.constant 0 : index
    %c0_0 = arith.constant 0 : index
    %0 = vector.load %arg1[%c0, %c0_0] : memref<8x126xf32, #tpu.memory_space<vmem>>, vector<8x126xf32>
    %c0_1 = arith.constant 0 : index
    %c0_2 = arith.constant 0 : index
    %1 = vector.load %arg2[%c0_1, %c0_2] : memref<8x126xf32, #tpu.memory_space<vmem>>, vector<8x126xf32>
    %2 = arith.addf %0, %1 : vector<8x126xf32>
    %cst = arith.constant 1.000000e-10 : f32
    %3 = vector.broadcast %cst : f32 to vector<8x126xf32>
    %4 = arith.addf %0, %3 : vector<8x126xf32>
    %5 = math.log %4 : vector<8x126xf32>
    %6 = arith.mulf %0, %5 : vector<8x126xf32>
    %cst_3 = arith.constant 1.000000e-10 : f32
    %7 = vector.broadcast %cst_3 : f32 to vector<8x126xf32>
    %8 = arith.addf %1, %7 : vector<8x126xf32>
    %9 = math.log %8 : vector<8x126xf32>
    %10 = arith.mulf %1, %9 : vector<8x126xf32>
    %11 = arith.addf %6, %10 : vector<8x126xf32>
    %cst_4 = arith.constant 5.000000e-01 : f32
    %12 = vector.broadcast %cst_4 : f32 to vector<8x126xf32>
    %13 = arith.mulf %12, %2 : vector<8x126xf32>
    %cst_5 = arith.constant 1.000000e-10 : f32
    %14 = vector.broadcast %cst_5 : f32 to vector<8x126xf32>
    %15 = arith.addf %13, %14 : vector<8x126xf32>
    %16 = math.log %15 : vector<8x126xf32>
    %17 = arith.mulf %2, %16 : vector<8x126xf32>
    %18 = arith.subf %11, %17 : vector<8x126xf32>
    %c0_6 = arith.constant 0 : index
    %c0_7 = arith.constant 0 : index
    %19 = vector.load %arg3[%c0_6, %c0_7] : memref<126x9xf32, #tpu.memory_space<vmem>>, vector<126x9xf32>
    %cst_8 = arith.constant dense<0.000000e+00> : vector<8x9xf32>
    %20 = tpu.matmul %18, %19, %cst_8 {dimension_numbers = #tpu.dot_dimension_numbers<[1], [0], [0], [1], [0, 0, 1, 1], [], []>} : vector<8x126xf32>, vector<126x9xf32>, vector<8x9xf32> -> vector<8x9xf32>
    %c0_9 = arith.constant 0 : index
    %c0_10 = arith.constant 0 : index
    %21 = vector.load %arg4[%c0_9, %c0_10] : memref<8x9xf32, #tpu.memory_space<vmem>>, vector<8x9xf32>
    tpu.vector_store %arg4[%c0_9, %c0_10], %20 {strides = array<i32>} : memref<8x9xf32, #tpu.memory_space<vmem>>, vector<8x9xf32>,
    return
  }
  func.func @transform_0(%arg0: i32) -> (i32, i32) {
    %c0_i32 = arith.constant 0 : i32
    %c0_i32_0 = arith.constant 0 : i32
    return %arg0, %c0_i32 : i32, i32
  }
  func.func @transform_1(%arg0: i32) -> (i32, i32) {
    %c0_i32 = arith.constant 0 : i32
    %c0_i32_0 = arith.constant 0 : i32
    return %arg0, %c0_i32 : i32, i32
  }
  func.func @transform_2(%arg0: i32) -> (i32, i32) {
    %c0_i32 = arith.constant 0 : i32
    %c0_i32_0 = arith.constant 0 : i32
    %c0_i32_1 = arith.constant 0 : i32
    return %c0_i32, %c0_i32_0 : i32, i32
  }
  func.func @transform_3(%arg0: i32) -> (i32, i32) {
    %c0_i32 = arith.constant 0 : i32
    %c0_i32_0 = arith.constant 0 : i32
    return %arg0, %c0_i32 : i32, i32
  }
}

</mosaic_0001>

<bundles_post_ra>
// kernel: tpu_custom_call.1
= control target key start
LH: loop header
LB: loop body
LE: loop exit
PB: predicated region body
PF: predicated region fallthrough
CT: control target
= control target key end

     0   :  { %vm53_vm0 = vcmask 1045504   ;;  %v228_v1 = vmov 0.0   ;;  %vm229_vm1 = vmmov 0   ;;  %s325_s0 = inlined_call_operand.vmem [shape: f32[8,126], index: 0, kind: input, shape index: {}]   ;;  %s326_s1 = inlined_call_operand.vmem [shape: f32[8,126], index: 1, kind: input, shape index: {}]   ;;  %s327_s2 = inlined_call_operand.vmem [shape: f32[126,9], index: 2, kind: input, shape index: {}]   ;;  %s328_s3 = inlined_call_operand.hbm [shape: f32[8,9], index: 3, kind: output, shape index: {}]  }
   0x1   :  { %v48_v0 = vld [vmem:[%s327_s2 + $0x78] sm:$0x3f]  ;;  %162 = vmatprep.subr.mxu0 %v228_v1  ;;  %v47_v2 = vld [vmem:[%s327_s2 + $0x70] sm:$0xff]  ;;  %194 = vmatprep.mubr.msk.f32.mxu0 %vm229_vm1, %v228_v1  ;;  %v46_v3 = vld [vmem:[%s327_s2 + $0x68] sm:$0xff] }
   0x2   :  { %163 = vmatpush3.msk.msra.mxu0 %vm53_vm0, %v48_v0  ;;  %v45_v4 = vld [vmem:[%s327_s2 + $0x60] sm:$0xff] }
   0x3   :  { %164 = vmatprep.subr.mxu0 %v228_v1  ;;  %v15_v5 = vld [vmem:[%s325_s0] sm:$0xff] }
   0x4   :  { %165 = vmatpush3.msra.mxu0 %v47_v2  ;;  %v16_v6 = vld [vmem:[%s326_s1] sm:$0xff]  ;;  %v18_v8 = vadd.f32 1e-10, %v15_v5 }
   0x5   :  { %166 = vmatprep.subr.mxu0 %v228_v1  ;;  %v17_v7 = vadd.f32 %v16_v6, %v15_v5  ;;  %v22_v9 = vadd.f32 1e-10, %v16_v6 }
   0x6   :  { %167 = vmatpush3.msra.mxu0 %v46_v3 }
   0x7   :  { %8 = vsyncpa [#allocation3], 0  ;;  %168 = vmatprep.subr.mxu0 %v228_v1  ;;  %v44_v10 = vld [vmem:[%s327_s2 + $0x58] sm:$0xff]  ;;  %200 = vlog2.f32 %v18_v8  ;;  %v27_v11 = vmul.f32 0.5, %v17_v7  ;;  %v43_v12 = vld [vmem:[%s327_s2 + $0x50] sm:$0xff]  ;;  %vm49_vm2 = vcmask 1031168  }
   0x8   :  { %169 = vmatpush3.msra.mxu0 %v45_v4  ;;  %202 = vlog2.f32 %v22_v9  ;;  %v42_v14 = vld [vmem:[%s327_s2 + $0x48] sm:$0xff]  ;;  %v41_v15 = vld [vmem:[%s327_s2 + $0x40] sm:$0xff]  ;;  %v40_v16 = vld [vmem:[%s327_s2 + $0x38] sm:$0xff]  ;;  %s230_s19 = smov [#allocation2]   ;;  %vm127_vm3 = vcmask 72704  }
   0x9   :  { %170 = vmatprep.subr.mxu0 %v228_v1  ;;  %v28_v13 = vadd.f32 1e-10, %v27_v11  ;;  %v39_v17 = vld [vmem:[%s327_s2 + $0x30] sm:$0xff]  ;;  %v38_v18 = vld [vmem:[%s327_s2 + $0x28] sm:$0xff]  ;;  %v37_v20 = vld [vmem:[%s327_s2 + $0x20] sm:$0xff]  ;;  %s135_s20 = sshll.u32 %s230_s19, 4  ;;  %s136_s20 = int_to_ptr.vmem [resolvable:$true] %s135_s20 }
   0xa   :  { %171 = vmatpush3.msra.mxu0 %v44_v10  ;;  %v36_v23 = vld [vmem:[%s327_s2 + $0x18] sm:$0xff]  ;;  %v35_v27 = vld [vmem:[%s327_s2 + $0x10] sm:$0xff]  ;;  %v34_v30 = vld [vmem:[%s327_s2 + $0x8] sm:$0xff]  ;;  %s206_s21 = scalar_lea.vmem %s136_s20, 128  ;;  %p211_p1 = scmp.lt.s32.totalorder %s136_s20, %s136_s20 }
   0xb   :  { %172 = vmatprep.subr.mxu0 %v228_v1  ;;  %204 = vlog2.f32 %v28_v13  ;;  %v33_v33 = vld [vmem:[%s327_s2] sm:$0xff]  ;;  %p207_p0 = scmp.ne.s32.totalorder %s136_s20, %s206_s21  ;;  %p212_p2 = scmp.lt.s32.totalorder %s206_s21, %s206_s21 }
   0xc   :  { %173 = vmatpush3.msra.mxu0 %v43_v12 }
   0xd   :  { %174 = vmatprep.subr.mxu0 %v228_v1  ;;  %p213_p3 = por %p212_p2, %p211_p1 }
   0xe   :  { %175 = vmatpush3.msra.mxu0 %v42_v14 }
   0xf   :  { %176 = vmatprep.subr.mxu0 %v228_v1  ;;  %p214_p4 = pnand %p213_p3, %p207_p0 }
  0x10   :  { %177 = vmatpush3.msra.mxu0 %v41_v15 }
  0x11   :  { %178 = vmatprep.subr.mxu0 %v228_v1 }
  0x12   :  { %179 = vmatpush3.msra.mxu0 %v40_v16 }
  0x13   :  { %180 = vmatprep.subr.mxu0 %v228_v1 }
  0x14   :  { %181 = vmatpush3.msra.mxu0 %v39_v17  ;;  %v201_v19 = vpop.eup %200 }
  0x15   :  { %182 = vmatprep.subr.mxu0 %v228_v1  ;;  %v203_v21 = vpop.eup %202  ;;  %v20_v22 = vmul.f32 0.6931472, %v201_v19 }
  0x16   :  { %183 = vmatpush3.msra.mxu0 %v38_v18  ;;  %v24_v24 = vmul.f32 0.6931472, %v203_v21 }
  0x17   :  { %184 = vmatprep.subr.mxu0 %v228_v1  ;;  %v21_v25 = vmul.f32 %v20_v22, %v15_v5 }
  0x18   :  { %185 = vmatpush3.msra.mxu0 %v37_v20  ;;  %v205_v26 = vpop.eup %204  ;;  %v25_v28 = vmul.f32 %v24_v24, %v16_v6 }
  0x19   :  { %186 = vmatprep.subr.mxu0 %v228_v1  ;;  %v30_v29 = vmul.f32 0.6931472, %v205_v26 }
  0x1a   :  { %187 = vmatpush3.msra.mxu0 %v36_v23  ;;  %v26_v31 = vadd.f32 %v25_v28, %v21_v25 }
  0x1b   :  { %188 = vmatprep.subr.mxu0 %v228_v1  ;;  %v31_v32 = vmul.f32 %v30_v29, %v17_v7 }
  0x1c   :  { %189 = vmatpush3.msra.mxu0 %v35_v27 }
  0x1d   :  { %190 = vmatprep.subr.mxu0 %v228_v1  ;;  %v32_v34 = vsub.f32 %v26_v31, %v31_v32 }
  0x1e   :  { %191 = vmatpush3.msra.mxu0 %v34_v30 }
  0x1f   :  { %192 = vmatprep.subr.mxu0 %v228_v1 }
  0x20   :  { %193 = vmatpush3.msra.mxu0 %v33_v33 }
  0x21   :  { %195 = vmatmul.mubr.msk.f32.vlgmr.msra.gmra.mxu0 %vm49_vm2, %v32_v34 }
  0xe1   :  { %v123_v35 = vpop.f32.mrf.mxu0 }
  0xe2   :  { %128 = vst.msk [vmem:[#allocation2] sm:$0xff] %vm127_vm3, %v123_v35 }
  0xe3   :  { %v196_v36 = vpop.f32.mrf.mxu0 }
  0xe4   :  { %217 = shalt.err (!%p214_p4)
}
  0xe5   :  { %138 = dma.vmem_to_hbm [thread:$0]  %s136_s20, 128, %s328_s3, [#allocation3]  }
  0xe6   :  { %226 = dma.done.wait [#allocation3], 128  }
  0xe7   :  { %227 = vsyncadd [#allocation3], 4294967168 }
  0xe8   :  { %142 = vsyncpa [#allocation3], 1 }

</bundles_post_ra>
